<compile_context>
chip_gen: v7x
topology: tpu7x:2x2x1
jax: 0.10.0
libtpu: 0.0.40
codegen_flags: <defaults>
</compile_context>

<pallas_src>
import jax
import jax.numpy as jnp
from jax.experimental import pallas as pl
from jax.experimental.pallas import tpu as pltpu

# Layer widths.
_F_OUT, _FC3_OUT, _FC4_OUT, _FC5_OUT = 84, 32, 16, 2

# Row offsets inside the packed small-weight blob (each start 8-sublane aligned).
_W3_ROW0 = 0                       # w3: (84, 32)
_W4_ROW0 = 88                      # w4: (32, 16)   (84 rounded up to 88)
_W5_ROW0 = 120                     # w5: (16, 2)
_WBLOB_ROWS = 136                  # 120 + 16
_BLOB_LANES = 128


def _poster_kernel(x_ref, wf_ref, wblob_ref, bblob_ref, out_ref):
    """Fused features-linear -> relu -> fc3 -> relu -> fc4 -> relu -> fc5 -> log_softmax."""
    x = x_ref[...]                                    # (TB, CHW) bf16
    wf = wf_ref[...]                                  # (CHW, 84) bf16

    # features_network (Linear) + ReLU; bf16 MXU matmul with f32 accumulation.
    bf = bblob_ref[0:1, 0:_F_OUT]                     # (1, 84) f32
    h = jnp.dot(x, wf, preferred_element_type=jnp.float32) + bf
    h = jnp.maximum(h, 0.0)                           # (TB, 84) f32

    # dropout(0.2): eval-mode identity.
    # fc3 + ReLU
    w3 = wblob_ref[_W3_ROW0:_W3_ROW0 + _F_OUT, 0:_FC3_OUT]
    b3 = bblob_ref[1:2, 0:_FC3_OUT]
    h = jnp.maximum(jnp.dot(h, w3, preferred_element_type=jnp.float32) + b3, 0.0)

    # fc4 + ReLU
    w4 = wblob_ref[_W4_ROW0:_W4_ROW0 + _FC3_OUT, 0:_FC4_OUT]
    b4 = bblob_ref[2:3, 0:_FC4_OUT]
    h = jnp.maximum(jnp.dot(h, w4, preferred_element_type=jnp.float32) + b4, 0.0)

    # dropout(0.2): eval-mode identity.
    # fc5
    w5 = wblob_ref[_W5_ROW0:_W5_ROW0 + _FC4_OUT, 0:_FC5_OUT]
    b5 = bblob_ref[3:4, 0:_FC5_OUT]
    logits = jnp.dot(h, w5, preferred_element_type=jnp.float32) + b5   # (TB, 2)

    # LogSoftmax over dim=1 (classes), max-subtracted for stability.
    m = jnp.max(logits, axis=1, keepdims=True)
    z = logits - m
    lse = jnp.log(jnp.sum(jnp.exp(z), axis=1, keepdims=True))
    out_ref[...] = (z - lse).astype(out_ref.dtype)


def poster_net_forward(x_image, x_plot, packed_params, *, tb=None):
    """JAX wrapper. x_image: (B, C, H, W) NCHW; x_plot unused (matches PyTorch forward)."""
    del x_plot  # PosterNet.forward never uses x_plot
    wf, wblob, bblob = packed_params
    B = x_image.shape[0]
    chw = int(x_image.shape[1] * x_image.shape[2] * x_image.shape[3])

    # Flatten NCHW -> (B, CHW).  Carry the dominant operand in bf16 so its HBM
    # footprint (and the kernel's input DMA bytes) are halved; accumulation in
    # the kernel stays f32.  (Ideally the upstream producer already emits bf16.)
    x_flat = x_image.reshape(B, chw)
    if x_flat.dtype != jnp.bfloat16:
        x_flat = x_flat.astype(jnp.bfloat16)

    # Batch tile: whole batch if small, else 1024-row tiles (double-buffered
    # bf16 tiles fit in <=5 MiB VMEM on every generation; bump on v6e/v7x with
    # vmem_limit_bytes if chasing the last few % of HBM roofline).
    if tb is None:
        tb = B if B <= 1024 else 1024
    grid = (pl.cdiv(B, tb),)

    out = pl.pallas_call(
        _poster_kernel,
        out_shape=jax.ShapeDtypeStruct((B, _FC5_OUT), jnp.float32),
        grid=grid,
        in_specs=[
            # Activations: tiled along the batch, pipelined per grid step.
            pl.BlockSpec((tb, chw), lambda i: (i, 0)),
            # Weights/biases: constant index maps -> fetched once, VMEM-resident.
            pl.BlockSpec((chw, _F_OUT), lambda i: (0, 0)),
            pl.BlockSpec((_WBLOB_ROWS, _BLOB_LANES), lambda i: (0, 0)),
            pl.BlockSpec((4, _BLOB_LANES), lambda i: (0, 0)),
        ],
        out_specs=pl.BlockSpec((tb, _FC5_OUT), lambda i: (i, 0)),
        compiler_params=pltpu.CompilerParams(
            dimension_semantics=("parallel",),  # v7x: shard batch tiles across both TCs
        ),
    )(x_flat, wf, wblob, bblob)
    return out


def init_params(key, in_dim):
    """Deterministic synthetic init.  Weights as (in, out); biases as (out,)."""
    ks = jax.random.split(key, 8)

    def lin(kw, kb, fan_in, fan_out):
        scale = 1.0 / jnp.sqrt(jnp.float32(fan_in))
        w = jax.random.uniform(kw, (fan_in, fan_out), jnp.float32, -scale, scale)
        b = jax.random.uniform(kb, (fan_out,), jnp.float32, -scale, scale)
        return w, b

    wf, bf = lin(ks[0], ks[1], in_dim, _F_OUT)        # features_network: flatten -> 84
    w3, b3 = lin(ks[2], ks[3], _F_OUT, _FC3_OUT)      # fc3
    w4, b4 = lin(ks[4], ks[5], _FC3_OUT, _FC4_OUT)    # fc4
    w5, b5 = lin(ks[6], ks[7], _FC4_OUT, _FC5_OUT)    # fc5
    return (wf, bf, w3, b3, w4, b4, w5, b5)


def pack_params(params):
    """One-time packing: bf16 first-layer weight + one small-weight blob + one bias blob."""
    wf, bf, w3, b3, w4, b4, w5, b5 = params
    wblob = jnp.zeros((_WBLOB_ROWS, _BLOB_LANES), jnp.float32)
    wblob = wblob.at[_W3_ROW0:_W3_ROW0 + _F_OUT, 0:_FC3_OUT].set(w3)
    wblob = wblob.at[_W4_ROW0:_W4_ROW0 + _FC3_OUT, 0:_FC4_OUT].set(w4)
    wblob = wblob.at[_W5_ROW0:_W5_ROW0 + _FC4_OUT, 0:_FC5_OUT].set(w5)
    bblob = jnp.zeros((4, _BLOB_LANES), jnp.float32)
    bblob = bblob.at[0, 0:_F_OUT].set(bf)
    bblob = bblob.at[1, 0:_FC3_OUT].set(b3)
    bblob = bblob.at[2, 0:_FC4_OUT].set(b4)
    bblob = bblob.at[3, 0:_FC5_OUT].set(b5)
    return (wf.astype(jnp.bfloat16), wblob, bblob)


def poster_net_reference(x_image, params):
    """Pure-JAX reference (uses the same bf16-rounded x / wf as the kernel)."""
    wf, bf, w3, b3, w4, b4, w5, b5 = params
    x = x_image.reshape(x_image.shape[0], -1)
    x = x.astype(jnp.bfloat16).astype(jnp.float32)
    wf32 = wf.astype(jnp.bfloat16).astype(jnp.float32)
    h = jnp.maximum(x @ wf32 + bf, 0.0)
    h = jnp.maximum(h @ w3 + b3, 0.0)
    h = jnp.maximum(h @ w4 + b4, 0.0)
    logits = h @ w5 + b5
    return jax.nn.log_softmax(logits, axis=1)


if __name__ == "__main__":
    key = jax.random.PRNGKey(0)
    k_img, k_plot, k_param = jax.random.split(key, 3)

    B, C, H, W = 2, 4, 16, 16
    x_image = jax.random.normal(k_img, (B, C, H, W), jnp.float32)   # NCHW
    x_plot = jax.random.normal(k_plot, (B, 8), jnp.float32)         # unused by forward

    params = init_params(k_param, C * H * W)
    packed = pack_params(params)

    y = poster_net_forward(x_image, x_plot, packed)
    y = jax.block_until_ready(y)

    y_ref = poster_net_reference(x_image, params)
    assert y.shape == (B, _FC5_OUT)
    assert jnp.allclose(y, y_ref, atol=2e-3, rtol=2e-3), "mismatch vs reference"
    # log_softmax rows should exponentiate-sum to 1
    assert jnp.allclose(jnp.sum(jnp.exp(y), axis=1), 1.0, atol=1e-4)

    print("KERNEL_OK")
</pallas_src>

<mosaic_0001>
module attributes {stable_mosaic.version = 11 : i64} {
  func.func @_poster_kernel(%arg0: i32, %arg1: memref<2x1024xbf16, #tpu.memory_space<vmem>>, %arg2: memref<1024x84xbf16, #tpu.memory_space<vmem>>, %arg3: memref<136x128xf32, #tpu.memory_space<vmem>>, %arg4: memref<4x128xf32, #tpu.memory_space<vmem>>, %arg5: memref<2x2xf32, #tpu.memory_space<vmem>>) attributes {dimension_semantics = [#tpu.dimension_semantics<parallel>], iteration_bounds = array<i64: 1>, scalar_prefetch = 0 : i64, scratch_operands = 0 : i64, tpu.core_type = #tpu.core_type<tc>, window_params = [{transform_indices = @transform_0, window_bounds = array<i64: 2, 1024>}, {pipeline_mode = #tpu.pipeline_mode<synchronous>, transform_indices = @transform_1, window_bounds = array<i64: 1024, 84>}, {pipeline_mode = #tpu.pipeline_mode<synchronous>, transform_indices = @transform_2, window_bounds = array<i64: 136, 128>}, {pipeline_mode = #tpu.pipeline_mode<synchronous>, transform_indices = @transform_3, window_bounds = array<i64: 4, 128>}, {transform_indices = @transform_4, window_bounds = array<i64: 2, 2>}]} {
    %c0 = arith.constant 0 : index
    %c0_0 = arith.constant 0 : index
    %0 = vector.load %arg1[%c0, %c0_0] : memref<2x1024xbf16, #tpu.memory_space<vmem>>, vector<2x1024xbf16>
    %c0_1 = arith.constant 0 : index
    %c0_2 = arith.constant 0 : index
    %1 = vector.load %arg2[%c0_1, %c0_2] : memref<1024x84xbf16, #tpu.memory_space<vmem>>, vector<1024x84xbf16>
    %c0_3 = arith.constant 0 : index
    %c0_4 = arith.constant 0 : index
    %2 = vector.load %arg4[%c0_3, %c0_4] : memref<4x128xf32, #tpu.memory_space<vmem>>, vector<1x84xf32>
    %cst = arith.constant dense<0.000000e+00> : vector<2x84xf32>
    %3 = tpu.matmul %0, %1, %cst {dimension_numbers = #tpu.dot_dimension_numbers<[1], [0], [0], [1], [0, 0, 1, 1], [], []>} : vector<2x1024xbf16>, vector<1024x84xbf16>, vector<2x84xf32> -> vector<2x84xf32>
    %4 = vector.broadcast %2 : vector<1x84xf32> to vector<2x84xf32>
    %5 = arith.addf %3, %4 : vector<2x84xf32>
    %cst_5 = arith.constant 0.000000e+00 : f32
    %6 = vector.broadcast %cst_5 : f32 to vector<2x84xf32>
    %7 = arith.maximumf %5, %6 : vector<2x84xf32>
    %c0_6 = arith.constant 0 : index
    %c0_7 = arith.constant 0 : index
    %8 = vector.load %arg3[%c0_6, %c0_7] : memref<136x128xf32, #tpu.memory_space<vmem>>, vector<84x32xf32>
    %c1 = arith.constant 1 : index
    %c0_8 = arith.constant 0 : index
    %9 = vector.load %arg4[%c1, %c0_8] : memref<4x128xf32, #tpu.memory_space<vmem>>, vector<1x32xf32>
    %cst_9 = arith.constant dense<0.000000e+00> : vector<2x32xf32>
    %10 = tpu.matmul %7, %8, %cst_9 {dimension_numbers = #tpu.dot_dimension_numbers<[1], [0], [0], [1], [0, 0, 1, 1], [], []>} : vector<2x84xf32>, vector<84x32xf32>, vector<2x32xf32> -> vector<2x32xf32>
    %11 = vector.broadcast %9 : vector<1x32xf32> to vector<2x32xf32>
    %12 = arith.addf %10, %11 : vector<2x32xf32>
    %cst_10 = arith.constant 0.000000e+00 : f32
    %13 = vector.broadcast %cst_10 : f32 to vector<2x32xf32>
    %14 = arith.maximumf %12, %13 : vector<2x32xf32>
    %c88 = arith.constant 88 : index
    %c0_11 = arith.constant 0 : index
    %15 = vector.load %arg3[%c88, %c0_11] : memref<136x128xf32, #tpu.memory_space<vmem>>, vector<32x16xf32>
    %c2 = arith.constant 2 : index
    %c0_12 = arith.constant 0 : index
    %16 = vector.load %arg4[%c2, %c0_12] : memref<4x128xf32, #tpu.memory_space<vmem>>, vector<1x16xf32>
    %cst_13 = arith.constant dense<0.000000e+00> : vector<2x16xf32>
    %17 = tpu.matmul %14, %15, %cst_13 {dimension_numbers = #tpu.dot_dimension_numbers<[1], [0], [0], [1], [0, 0, 1, 1], [], []>} : vector<2x32xf32>, vector<32x16xf32>, vector<2x16xf32> -> vector<2x16xf32>
    %18 = vector.broadcast %16 : vector<1x16xf32> to vector<2x16xf32>
    %19 = arith.addf %17, %18 : vector<2x16xf32>
    %cst_14 = arith.constant 0.000000e+00 : f32
    %20 = vector.broadcast %cst_14 : f32 to vector<2x16xf32>
    %21 = arith.maximumf %19, %20 : vector<2x16xf32>
    %c120 = arith.constant 120 : index
    %c0_15 = arith.constant 0 : index
    %22 = vector.load %arg3[%c120, %c0_15] : memref<136x128xf32, #tpu.memory_space<vmem>>, vector<16x2xf32>
    %c3 = arith.constant 3 : index
    %c0_16 = arith.constant 0 : index
    %23 = vector.load %arg4[%c3, %c0_16] : memref<4x128xf32, #tpu.memory_space<vmem>>, vector<1x2xf32>
    %cst_17 = arith.constant dense<0.000000e+00> : vector<2x2xf32>
    %24 = tpu.matmul %21, %22, %cst_17 {dimension_numbers = #tpu.dot_dimension_numbers<[1], [0], [0], [1], [0, 0, 1, 1], [], []>} : vector<2x16xf32>, vector<16x2xf32>, vector<2x2xf32> -> vector<2x2xf32>
    %25 = vector.broadcast %23 : vector<1x2xf32> to vector<2x2xf32>
    %26 = arith.addf %24, %25 : vector<2x2xf32>
    %cst_18 = arith.constant dense<0xFF800000> : vector<2xf32>
    %27 = vector.multi_reduction <maximumf>, %26, %cst_18 [1] : vector<2x2xf32> to vector<2xf32>
    %28 = vector.shape_cast %27 : vector<2xf32> to vector<2x1xf32>
    %29 = vector.broadcast %28 : vector<2x1xf32> to vector<2x2xf32>
    %30 = arith.subf %26, %29 : vector<2x2xf32>
    %31 = math.exp %30 : vector<2x2xf32>
    %cst_19 = arith.constant dense<0.000000e+00> : vector<2xf32>
    %32 = vector.multi_reduction <add>, %31, %cst_19 [1] : vector<2x2xf32> to vector<2xf32>
    %33 = vector.shape_cast %32 : vector<2xf32> to vector<2x1xf32>
    %34 = math.log %33 : vector<2x1xf32>
    %35 = vector.broadcast %34 : vector<2x1xf32> to vector<2x2xf32>
    %36 = arith.subf %30, %35 : vector<2x2xf32>
    %c0_20 = arith.constant 0 : index
    %c0_21 = arith.constant 0 : index
    %37 = vector.load %arg5[%c0_20, %c0_21] : memref<2x2xf32, #tpu.memory_space<vmem>>, vector<2x2xf32>
    tpu.vector_store %arg5[%c0_20, %c0_21], %36 {strides = array<i32>} : memref<2x2xf32, #tpu.memory_space<vmem>>, vector<2x2xf32>,
    return
  }
  func.func @transform_0(%arg0: i32) -> (i32, i32) {
    %c0_i32 = arith.constant 0 : i32
    %c0_i32_0 = arith.constant 0 : i32
    return %arg0, %c0_i32 : i32, i32
  }
  func.func @transform_1(%arg0: i32) -> (i32, i32) {
    %c0_i32 = arith.constant 0 : i32
    %c0_i32_0 = arith.constant 0 : i32
    %c0_i32_1 = arith.constant 0 : i32
    return %c0_i32, %c0_i32_0 : i32, i32
  }
  func.func @transform_2(%arg0: i32) -> (i32, i32) {
    %c0_i32 = arith.constant 0 : i32
    %c0_i32_0 = arith.constant 0 : i32
    %c0_i32_1 = arith.constant 0 : i32
    return %c0_i32, %c0_i32_0 : i32, i32
  }
  func.func @transform_3(%arg0: i32) -> (i32, i32) {
    %c0_i32 = arith.constant 0 : i32
    %c0_i32_0 = arith.constant 0 : i32
    %c0_i32_1 = arith.constant 0 : i32
    return %c0_i32, %c0_i32_0 : i32, i32
  }
  func.func @transform_4(%arg0: i32) -> (i32, i32) {
    %c0_i32 = arith.constant 0 : i32
    %c0_i32_0 = arith.constant 0 : i32
    return %arg0, %c0_i32 : i32, i32
  }
}

</mosaic_0001>

<bundles_post_ra>
// kernel: tpu_custom_call.1
= control target key start
LH: loop header
LB: loop body
LE: loop exit
PB: predicated region body
PF: predicated region fallthrough
CT: control target
= control target key end

     0   :  { %v158_v28 = vlaneseq  ;;  %v1389_v36 = vmov 1966171168   ;;  %s1716_s0 = inlined_call_operand.vmem [shape: bf16[2,1024], index: 0, kind: input, shape index: {}]   ;;  %s1717_s1 = inlined_call_operand.vmem [shape: bf16[1024,84], index: 1, kind: input, shape index: {}]   ;;  %s1718_s2 = inlined_call_operand.vmem [shape: f32[136,128], index: 2, kind: input, shape index: {}]   ;;  %s1719_s3 = inlined_call_operand.vmem [shape: f32[4,128], index: 3, kind: input, shape index: {}]   ;;  %s1720_s4 = inlined_call_operand.hbm [shape: f32[2,2], index: 4, kind: output, shape index: {}]  }
   0x1   :  { %v1296_v0 = vld [vmem:[%s1717_s1 + $0x40] sm:$0xff]   ;;  %v1300_v4 = vld [vmem:[%s1717_s1 + $0x48] sm:$0xff]   ;;  %v1304_v8 = vld [vmem:[%s1717_s1 + $0x50] sm:$0xff]   ;;  %v156_v37 = vunpack.c.l.s4 %v1389_v36 }
   0x2   :  { %v1297_v1 = vld [vmem:[%s1717_s1 + $0xc0] sm:$0xff]   ;;  %1116 = vmatprep.subr.bf16.mxu0 %v1296_v0  ;;  %v1301_v5 = vld [vmem:[%s1717_s1 + $0xc8] sm:$0xff]   ;;  %v1305_v9 = vld [vmem:[%s1717_s1 + $0xd0] sm:$0xff]   ;;  %v159_v33 = vshrl.u32 %v158_v28, 7 }
   0x3   :  { %v1298_v2 = vld [vmem:[%s1717_s1] sm:$0xff]   ;;  %1138 = vmatprep.subr.bf16.mxu1 %v1297_v1  ;;  %v1302_v6 = vld [vmem:[%s1717_s1 + $0x8] sm:$0xff]   ;;  %v1306_v10 = vld [vmem:[%s1717_s1 + $0x10] sm:$0xff]   ;;  %v157_v40 = vunpack.c.0.s8 %v156_v37 }
   0x4   :  { %v1299_v3 = vld [vmem:[%s1717_s1 + $0x80] sm:$0xff]   ;;  %1117 = vmatpush3.bf16.msra.mxu0 %v1298_v2  ;;  %v1303_v7 = vld [vmem:[%s1717_s1 + $0x88] sm:$0xff]   ;;  %v1307_v11 = vld [vmem:[%s1717_s1 + $0x90] sm:$0xff]  }
   0x5   :  { %1139 = vmatpush3.bf16.msra.mxu1 %v1299_v3  ;;  %1118 = vmatprep.subr.bf16.mxu0 %v1300_v4  ;;  %v1308_v12 = vld [vmem:[%s1717_s1 + $0x58] sm:$0xff]   ;;  %v1312_v16 = vld [vmem:[%s1717_s1 + $0x60] sm:$0xff]   ;;  %v1316_v20 = vld [vmem:[%s1717_s1 + $0x68] sm:$0xff]   ;;  %v1524_v41 = vsub.s32 %v157_v40, %v159_v33 }
   0x6   :  { %1140 = vmatprep.subr.bf16.mxu1 %v1301_v5  ;;  %v1309_v13 = vld [vmem:[%s1717_s1 + $0xd8] sm:$0xff]   ;;  %v1313_v17 = vld [vmem:[%s1717_s1 + $0xe0] sm:$0xff]   ;;  %v1317_v21 = vld [vmem:[%s1717_s1 + $0xe8] sm:$0xff]  }
   0x7   :  { %v1310_v14 = vld [vmem:[%s1717_s1 + $0x18] sm:$0xff]   ;;  %v1314_v18 = vld [vmem:[%s1717_s1 + $0x20] sm:$0xff]   ;;  %v1318_v22 = vld [vmem:[%s1717_s1 + $0x28] sm:$0xff]  }
   0x8   :  { %1119 = vmatpush3.bf16.msra.mxu0 %v1302_v6  ;;  %v1311_v15 = vld [vmem:[%s1717_s1 + $0x98] sm:$0xff]   ;;  %v1315_v19 = vld [vmem:[%s1717_s1 + $0xa0] sm:$0xff]   ;;  %v1319_v23 = vld [vmem:[%s1717_s1 + $0xa8] sm:$0xff]  }
   0x9   :  { %1141 = vmatpush3.bf16.msra.mxu1 %v1303_v7  ;;  %1120 = vmatprep.subr.bf16.mxu0 %v1304_v8  ;;  %v1320_v24 = vld [vmem:[%s1717_s1 + $0x70] sm:$0xff]   ;;  %v1324_v29 = vld [vmem:[%s1717_s1 + $0x78] sm:$0xff]   ;;  %v19_v34 = vld [vmem:[%s1716_s0] sm:$0xff] }
   0xa   :  { %1142 = vmatprep.subr.bf16.mxu1 %v1305_v9  ;;  %v1321_v25 = vld [vmem:[%s1717_s1 + $0xf0] sm:$0xff]   ;;  %v1325_v30 = vld [vmem:[%s1717_s1 + $0xf8] sm:$0xff]   ;;  %v1329_v35 = vld [vmem:[%s1717_s1 + $0x140] sm:$0xff]   ;;  %v154_v39 = vcombine.high %v19_v34, %v19_v34  ;;  %v161_v42 = vrot.slane %v19_v34, %v1524_v41 }
   0xb   :  { %v1322_v26 = vld [vmem:[%s1717_s1 + $0x30] sm:$0xff]   ;;  %v1326_v31 = vld [vmem:[%s1717_s1 + $0x38] sm:$0xff]   ;;  %v1330_v38 = vld [vmem:[%s1717_s1 + $0x1c0] sm:$0xff]  }
   0xc   :  { %1121 = vmatpush3.bf16.msra.mxu0 %v1306_v10  ;;  %v1323_v27 = vld [vmem:[%s1717_s1 + $0xb0] sm:$0xff]   ;;  %v1327_v32 = vld [vmem:[%s1717_s1 + $0xb8] sm:$0xff]   ;;  %v1528_v43 = vrot.slane %v154_v39, %v1524_v41  ;;  %v169_v44 = vcombine.high %v161_v42, %v161_v42  ;;  %v177_v45 = vrot.slane %v161_v42, %v1524_v41  ;;  %v1331_v48 = vld [vmem:[%s1717_s1 + $0x100] sm:$0xff]  }
   0xd   :  { %1143 = vmatpush3.bf16.msra.mxu1 %v1307_v11  ;;  %1122 = vmatprep.subr.bf16.mxu0 %v1308_v12  ;;  %v1333_v51 = vld [vmem:[%s1717_s1 + $0x148] sm:$0xff]   ;;  %v1332_v53 = vld [vmem:[%s1717_s1 + $0x180] sm:$0xff]   ;;  %v1337_v57 = vld [vmem:[%s1717_s1 + $0x150] sm:$0xff]  }
   0xe   :  { %1144 = vmatprep.subr.bf16.mxu1 %v1309_v13  ;;  %v170_v46 = vcombine.high %v1528_v43, %v1528_v43  ;;  %v191_v47 = vrot.slane %v169_v44, %v1524_v41  ;;  %v199_v50 = vcombine.high %v177_v45, %v177_v45  ;;  %v1334_v54 = vld [vmem:[%s1717_s1 + $0x1c8] sm:$0xff]   ;;  %v1338_v59 = vld [vmem:[%s1717_s1 + $0x1d0] sm:$0xff]   ;;  %v1341_v61 = vld [vmem:[%s1717_s1 + $0x158] sm:$0xff]  }
   0xf   :  { %v1335_v56 = vld [vmem:[%s1717_s1 + $0x108] sm:$0xff]   ;;  %v1339_v60 = vld [vmem:[%s1717_s1 + $0x110] sm:$0xff]   ;;  %v1342_v63 = vld [vmem:[%s1717_s1 + $0x1d8] sm:$0xff]  }
  0x10   :  { %1123 = vmatpush3.bf16.msra.mxu0 %v1310_v14  ;;  %v198_v49 = vrot.slane %v170_v46, %v1524_v41  ;;  %627 = vmatprep.mubr.bf16.mxu0 %v191_v47  ;;  %v201_v52 = vcombine.high %v191_v47, %v191_v47  ;;  %v1336_v58 = vld [vmem:[%s1717_s1 + $0x188] sm:$0xff]   ;;  %v1340_v62 = vld [vmem:[%s1717_s1 + $0x190] sm:$0xff]   ;;  %v1343_v0 = vld [vmem:[%s1717_s1 + $0x118] sm:$0xff]  }
  0x11   :  { %1145 = vmatpush3.bf16.msra.mxu1 %v1311_v15  ;;  %1124 = vmatprep.subr.bf16.mxu0 %v1312_v16  ;;  %v1345_v1 = vld [vmem:[%s1717_s1 + $0x160] sm:$0xff]   ;;  %v1344_v2 = vld [vmem:[%s1717_s1 + $0x198] sm:$0xff]   ;;  %v1349_v5 = vld [vmem:[%s1717_s1 + $0x168] sm:$0xff]  }
  0x12   :  { %1146 = vmatprep.subr.bf16.mxu1 %v1313_v17  ;;  %v202_v55 = vcombine.high %v198_v49, %v198_v49  ;;  %667 = vmatprep.mubr.bf16.mxu1 %v201_v52  ;;  %v1346_v3 = vld [vmem:[%s1717_s1 + $0x1e0] sm:$0xff]   ;;  %v1350_v7 = vld [vmem:[%s1717_s1 + $0x1e8] sm:$0xff]   ;;  %v1353_v9 = vld [vmem:[%s1717_s1 + $0x170] sm:$0xff]  }
  0x13   :  { %v1347_v4 = vld [vmem:[%s1717_s1 + $0x120] sm:$0xff]   ;;  %v1351_v8 = vld [vmem:[%s1717_s1 + $0x128] sm:$0xff]  }
  0x14   :  { %1125 = vmatpush3.bf16.msra.mxu0 %v1314_v18  ;;  %v1348_v6 = vld [vmem:[%s1717_s1 + $0x1a0] sm:$0xff]  }
  0x15   :  { %1147 = vmatpush3.bf16.msra.mxu1 %v1315_v19  ;;  %1126 = vmatprep.subr.bf16.mxu0 %v1316_v20 }
  0x16   :  { %1148 = vmatprep.subr.bf16.mxu1 %v1317_v21 }
  0x18   :  { %1127 = vmatpush3.bf16.msra.mxu0 %v1318_v22 }
  0x19   :  { %1149 = vmatpush3.bf16.msra.mxu1 %v1319_v23  ;;  %1128 = vmatprep.subr.bf16.mxu0 %v1320_v24 }
  0x1a   :  { %1150 = vmatprep.subr.bf16.mxu1 %v1321_v25 }
  0x1c   :  { %1129 = vmatpush3.bf16.msra.mxu0 %v1322_v26 }
  0x1d   :  { %1151 = vmatpush3.bf16.msra.mxu1 %v1323_v27  ;;  %1130 = vmatprep.subr.bf16.mxu0 %v1324_v29 }
  0x1e   :  { %1152 = vmatprep.subr.bf16.mxu1 %v1325_v30 }
  0x20   :  { %1131 = vmatpush3.bf16.msra.mxu0 %v1326_v31 }
  0x21   :  { %1153 = vmatpush3.bf16.msra.mxu1 %v1327_v32  ;;  %1160 = vmatprep.subr.bf16.mxu0 %v1329_v35 }
  0x22   :  { %1182 = vmatprep.subr.bf16.mxu1 %v1330_v38 }
  0x23   :  { %628 = vmatmul.mubr.bf16.vlgmr.msra.gmra.mrb[0].mxu0 %v177_v45 }
  0x24   :  { %1161 = vmatpush3.bf16.msra.mxu0 %v1331_v48  ;;  %668 = vmatmul.mubr.bf16.vlgmr.msra.gmra.mrb[0].mxu1 %v199_v50 }
  0x25   :  { %1162 = vmatprep.subr.bf16.mxu0 %v1333_v51  ;;  %1183 = vmatpush3.bf16.msra.mxu1 %v1332_v53 }
  0x26   :  { %707 = vmatprep.mubr.bf16.mxu0 %v198_v49  ;;  %1184 = vmatprep.subr.bf16.mxu1 %v1334_v54 }
  0x27   :  { %747 = vmatprep.mubr.bf16.mxu1 %v202_v55 }
  0x28   :  { %1163 = vmatpush3.bf16.msra.mxu0 %v1335_v56 }
  0x29   :  { %1164 = vmatprep.subr.bf16.mxu0 %v1337_v57  ;;  %1185 = vmatpush3.bf16.msra.mxu1 %v1336_v58 }
  0x2a   :  { %1186 = vmatprep.subr.bf16.mxu1 %v1338_v59 }
  0x2c   :  { %1165 = vmatpush3.bf16.msra.mxu0 %v1339_v60 }
  0x2d   :  { %1166 = vmatprep.subr.bf16.mxu0 %v1341_v61  ;;  %1187 = vmatpush3.bf16.msra.mxu1 %v1340_v62 }
  0x2e   :  { %1188 = vmatprep.subr.bf16.mxu1 %v1342_v63 }
  0x30   :  { %1167 = vmatpush3.bf16.msra.mxu0 %v1343_v0 }
  0x31   :  { %1168 = vmatprep.subr.bf16.mxu0 %v1345_v1  ;;  %1189 = vmatpush3.bf16.msra.mxu1 %v1344_v2 }
  0x32   :  { %1190 = vmatprep.subr.bf16.mxu1 %v1346_v3 }
  0x34   :  { %1169 = vmatpush3.bf16.msra.mxu0 %v1347_v4 }
  0x35   :  { %1170 = vmatprep.subr.bf16.mxu0 %v1349_v5 }
  0x36   :  { %9 = vsyncpa [#allocation3], 0  ;;  %1191 = vmatpush3.bf16.msra.mxu1 %v1348_v6  ;;  %v1352_v10 = vld [vmem:[%s1717_s1 + $0x1a8] sm:$0xff]   ;;  %v1354_v11 = vld [vmem:[%s1717_s1 + $0x1f0] sm:$0xff]   ;;  %v184_v17 = vrot.slane %v1528_v43, %v1524_v41  ;;  %v1390_v23 = vmov 0.0|0.0   ;;  %vm776_vm0 = vcmask 1043456  }
  0x37   :  { %1192 = vmatprep.subr.bf16.mxu1 %v1350_v7  ;;  %v1355_v12 = vld [vmem:[%s1717_s1 + $0x130] sm:$0xff]   ;;  %v1357_v13 = vld [vmem:[%s1717_s1 + $0x178] sm:$0xff]   ;;  %v756_v20 = vld [vmem:[%s1718_s2] sm:$0xff]  ;;  %v1391_v37 = vmov 0.0   ;;  %vm1392_vm1 = vmmov 0   ;;  %vm772_vm2 = vcmask 687104  }
  0x38   :  { %1171 = vmatpush3.bf16.msra.mxu0 %v1351_v8  ;;  %v1356_v14 = vld [vmem:[%s1717_s1 + $0x1b0] sm:$0xff]   ;;  %v1358_v15 = vld [vmem:[%s1717_s1 + $0x1f8] sm:$0xff]   ;;  %v200_v19 = vcombine.high %v184_v17, %v184_v17  ;;  %v757_v21 = vld [vmem:[%s1718_s2 + $0x8] sm:$0xff]  ;;  %vm860_vm3 = vcmask 261120   ;;  %vm942_vm4 = vcmask 130048   ;;  %vm1016_vm5 = vcmask 9216  }
  0x39   :  { %1172 = vmatprep.subr.bf16.mxu0 %v1353_v9  ;;  %v1359_v16 = vld [vmem:[%s1717_s1 + $0x138] sm:$0xff]   ;;  %v758_v22 = vld [vmem:[%s1718_s2 + $0x10] sm:$0xff]  ;;  %v1268_v24 = vpack.c.bf16 %v757_v21, %v756_v20  ;;  %v760_v27 = vld [vmem:[%s1718_s2 + $0x20] sm:$0xff] }
  0x3a   :  { %1193 = vmatpush3.bf16.msra.mxu1 %v1352_v10  ;;  %v1360_v18 = vld [vmem:[%s1717_s1 + $0x1b8] sm:$0xff]   ;;  %v761_v28 = vld [vmem:[%s1718_s2 + $0x28] sm:$0xff]  ;;  %v762_v30 = vld [vmem:[%s1718_s2 + $0x30] sm:$0xff] }
  0x3b   :  { %1194 = vmatprep.subr.bf16.mxu1 %v1354_v11  ;;  %v759_v25 = vld [vmem:[%s1718_s2 + $0x18] sm:$0xff]  ;;  %v1274_v29 = vpack.c.bf16 %v761_v28, %v760_v27  ;;  %v764_v33 = vld [vmem:[%s1718_s2 + $0x40] sm:$0xff]  ;;  %v765_v34 = vld [vmem:[%s1718_s2 + $0x48] sm:$0xff] }
  0x3c   :  { %1173 = vmatpush3.bf16.msra.mxu0 %v1355_v12  ;;  %v1271_v26 = vpack.c.bf16 %v759_v25, %v758_v22  ;;  %v763_v31 = vld [vmem:[%s1718_s2 + $0x38] sm:$0xff]  ;;  %v1280_v35 = vpack.c.bf16 %v765_v34, %v764_v33  ;;  %v766_v36 = vld [vmem:[%s1718_s2 + $0x50] sm:$0xf]  ;;  %v852_v39 = vld [vmem:[%s1718_s2 + $0x60] sm:$0xff] }
  0x3d   :  { %1174 = vmatprep.subr.bf16.mxu0 %v1357_v13  ;;  %v1277_v32 = vpack.c.bf16 %v763_v31, %v762_v30  ;;  %v851_v38 = vld [vmem:[%s1718_s2 + $0x58] sm:$0xff]  ;;  %v1044_v42 = vld [vmem:[%s1719_s3] ss:$0 sm:$0xff]  ;;  %v853_v3 = vld [vmem:[%s1718_s2 + $0x68] sm:$0xff] }
  0x3e   :  { %1195 = vmatpush3.bf16.msra.mxu1 %v1356_v14  ;;  %v1283_v40 = vpack.c.bf16 %v852_v39, %v851_v38  ;;  %v854_v4 = vld [vmem:[%s1718_s2 + $0x70] sm:$0xff]  ;;  %v1109_v6 = vld [vmem:[%s1719_s3 + $0x1] ss:$0 sm:$0xff]  ;;  %v935_v11 = vld [vmem:[%s1718_s2 + $0x78] sm:$0xff] }
  0x3f   :  { %1196 = vmatprep.subr.bf16.mxu1 %v1358_v15  ;;  %v1286_v5 = vpack.c.bf16 %v854_v4, %v853_v3  ;;  %v936_v12 = vld [vmem:[%s1718_s2 + $0x80] sm:$0xff]  ;;  %s1393_s2 = smov [#allocation2]  }
  0x40   :  { %1175 = vmatpush3.bf16.msra.mxu0 %v1359_v16  ;;  %v1289_v13 = vpack.c.bf16 %v936_v12, %v935_v11  ;;  %v1112_v14 = vld [vmem:[%s1719_s3 + $0x2] ss:$0 sm:$0xff] }
  0x41   :  { %1267 = vmatprep.subr.bf16.mxu0 %v1390_v23 }
  0x42   :  { %1197 = vmatpush3.bf16.msra.mxu1 %v1360_v18 }
  0x43   :  { %708 = vmatmul.mubr.bf16.vlgmr.msra.gmra.mrb[4].mxu0 %v184_v17  ;;  %1282 = vmatprep.subr.bf16.mxu1 %v1390_v23 }
  0x44   :  { %1269 = vmatpush3.bf16.msra.mxu0 %v1268_v24  ;;  %1246 = vmatprep.mubr.msk.f32.mxu0 %vm1392_vm1, %v1391_v37 }
  0x45   :  { %748 = vmatmul.mubr.bf16.vlgmr.msra.gmra.mrb[4].mxu1 %v200_v19  ;;  %1270 = vmatprep.subr.bf16.mxu0 %v1390_v23  ;;  %v1114_v19 = vld [vmem:[%s1719_s3 + $0x3] ss:$0 sm:$0xff]  ;;  %s1036_s3 = sshll.u32 %s1393_s2, 4  ;;  %s1037_s3 = int_to_ptr.vmem [resolvable:$true] %s1036_s3 }
  0x46   :  { %1257 = vmatprep.mubr.msk.f32.mxu1 %vm1392_vm1, %v1391_v37  ;;  %1284 = vmatpush3.bf16.msra.mxu1 %v1283_v40  ;;  %s1365_s25 = scalar_lea.vmem %s1037_s3, 32  ;;  %p1370_p1 = scmp.lt.s32.totalorder %s1037_s3, %s1037_s3 }
  0x47   :  { %1285 = vmatprep.subr.bf16.mxu1 %v1390_v23  ;;  %p1366_p0 = scmp.ne.s32.totalorder %s1037_s3, %s1365_s25  ;;  %p1371_p2 = scmp.lt.s32.totalorder %s1365_s25, %s1365_s25 }
  0x48   :  { %1272 = vmatpush3.bf16.msra.mxu0 %v1271_v26 }
  0x49   :  { %1273 = vmatprep.subr.bf16.mxu0 %v1390_v23  ;;  %p1372_p3 = por %p1371_p2, %p1370_p1 }
  0x4a   :  { %1287 = vmatpush3.bf16.msra.mxu1 %v1286_v5 }
  0x4b   :  { %1288 = vmatprep.subr.bf16.mxu1 %v1390_v23  ;;  %p1373_p4 = pnand %p1372_p3, %p1366_p0 }
  0x4c   :  { %1275 = vmatpush3.bf16.msra.mxu0 %v1274_v29 }
  0x4d   :  { %1276 = vmatprep.subr.bf16.mxu0 %v1390_v23 }
  0x50   :  { %1278 = vmatpush3.bf16.msra.mxu0 %v1277_v32 }
  0x51   :  { %1279 = vmatprep.subr.bf16.mxu0 %v1390_v23 }
  0x54   :  { %1281 = vmatpush3.bf16.msra.mxu0 %v1280_v35 }
  0x55   :  { %1244 = vmatprep.subr.mxu0 %v1391_v37 }
  0x58   :  { %1245 = vmatpush3.msk.msra.mxu0 %vm776_vm0, %v766_v36 }
  0xf6   :  { %v1132_v41 = vpop.f32.mrb[0].mxu0 }
  0xf7   :  { %v1133_v43 = vpop.f32.mrb[1].mxu0  ;;  %v1154_v44 = vpop.f32.mrb[0].mxu1 }
  0xf8   :  { %v1134_v45 = vadd.f32 %v1133_v43, %v1132_v41  ;;  %v1135_v46 = vpop.f32.mrb[2].mxu0  ;;  %v1155_v47 = vpop.f32.mrb[1].mxu1 }
  0xf9   :  { %v1136_v48 = vpop.f32.mrb[3].mxu0  ;;  %v1156_v50 = vadd.f32 %v1155_v47, %v1154_v44  ;;  %v1157_v51 = vpop.f32.mrb[2].mxu1 }
  0xfa   :  { %v630_v49 = vadd.f32 %v1134_v45, %v1044_v42  ;;  %v1158_v52 = vpop.f32.mrb[3].mxu1 }
  0xfc   :  { %v670_v53 = vadd.f32 %v1156_v50, %v630_v49 }
 0x116   :  { %v1176_v54 = vpop.f32.mrb[4].mxu0 }
 0x117   :  { %v1177_v55 = vpop.f32.mrb[5].mxu0 }
 0x118   :  { %v1198_v56 = vpop.f32.mrb[4].mxu1  ;;  %v1178_v57 = vadd.f32 %v1177_v55, %v1176_v54  ;;  %v1179_v58 = vpop.f32.mrb[6].mxu0 }
 0x119   :  { %v1199_v59 = vpop.f32.mrb[5].mxu1  ;;  %v1180_v60 = vpop.f32.mrb[7].mxu0 }
 0x11a   :  { %v710_v61 = vadd.f32 %v1178_v57, %v670_v53  ;;  %v1200_v62 = vadd.f32 %v1199_v59, %v1198_v56  ;;  %v1201_v63 = vpop.f32.mrb[6].mxu1 }
 0x11b   :  { %v1202_v0 = vpop.f32.mrb[7].mxu1 }
 0x11c   :  { %v750_v1 = vadd.f32 %v1200_v62, %v710_v61 }
 0x11e   :  { %v755_v2 = vmax.f32 %v750_v1, 0.0 }
 0x120   :  { %1247 = vmatmul.mubr.msk.f32.vlgmr.msra.gmra.mrb[8].mxu0 %vm772_vm2, %v755_v2 }
 0x1f3   :  { %v846_v7 = vpop.f32.mrb[8].mxu0 }
 0x1f4   :  { %v847_v8 = vadd.f32 %v1109_v6, %v846_v7  ;;  %v1248_v9 = vpop.f32.mrb[9].mxu0 }
 0x1f6   :  { %v850_v10 = vmax.f32 %v847_v8, 0.0 }
 0x1f8   :  { %1258 = vmatmul.mubr.msk.f32.vlgmr.msra.gmra.mrb[8].mxu1 %vm860_vm3, %v850_v10 }
 0x1f9   :  { %1264 = vmatprep.mubr.msk.f32.mxu1 %vm1392_vm1, %v1391_v37  ;;  %1290 = vmatpush3.bf16.msra.mxu1 %v1289_v13 }
 0x2cb   :  { %v930_v15 = vpop.f32.mrb[8].mxu1 }
 0x2cc   :  { %v931_v16 = vadd.f32 %v1112_v14, %v930_v15  ;;  %v1259_v17 = vpop.f32.mrb[9].mxu1 }
 0x2ce   :  { %v934_v18 = vmax.f32 %v931_v16, 0.0 }
 0x2d0   :  { %1265 = vmatmul.mubr.msk.f32.vlgmr.msra.gmra.mrb[10].mxu1 %vm942_vm4, %v934_v18 }
 0x3a3   :  { %v1012_v20 = vpop.f32.mrb[10].mxu1 }
 0x3a4   :  { %v1013_v21 = vadd.f32 %v1114_v19, %v1012_v20  ;;  %v1266_v22 = vpop.f32.mrb[11].mxu1 }
 0x3a6   :  { %v1017_v23 = vsel %vm1016_vm5, %v1013_v21, -inf }
 0x3a7   :  { %1018 = vmax.xlane.f32.xlu0 %v1017_v23 }
 0x434   :  { %v1019_v24 = vpop.xlane.xlu0 %1018 }
 0x435   :  { %v1020_v25 = vsub.f32 %v1013_v21, %v1019_v24 }
 0x437   :  { %v1021_v26 = vmul.f32 1.442695, %v1020_v25 }
 0x439   :  { %1361 = vpow2.f32 %v1021_v26 }
 0x443   :  { %v1362_v27 = vpop.eup %1361 }
 0x444   :  { %v1023_v28 = vsel %vm1016_vm5, %v1362_v27, 0.0 }
 0x445   :  { %1024 = vadd.xlane.f32.xlu0 %v1023_v28 }
 0x4d2   :  { %v1025_v29 = vpop.xlane.xlu0 %1024 }
 0x4d3   :  { %1363 = vlog2.f32 %v1025_v29 }
 0x4dd   :  { %v1364_v30 = vpop.eup %1363 }
 0x4de   :  { %v1027_v31 = vmul.f32 0.6931472, %v1364_v30 }
 0x4e0   :  { %v1028_v32 = vsub.f32 %v1020_v25, %v1027_v31 }
 0x4e2   :  { %1029 = vst.msk [vmem:[#allocation2] sm:$0x3] %vm1016_vm5, %v1028_v32 }
 0x4e3   :  { %1376 = shalt.err (!%p1373_p4)
}
 0x4e4   :  { %s1377_s28 = scalar_lea.hbm %s1720_s4, 32 }
 0x4e5   :  { %p1378_p5 = scmp.ne.s32.totalorder %s1720_s4, %s1377_s28  ;;  %p1381_p6 = scmp.lt.u32.totalorder %s1377_s28, %s1720_s4 }
 0x4e7   :  { %p1383_p7 = pnand %p1381_p6, %p1378_p5 }
 0x4e9   :  { %1386 = shalt.err (!%p1383_p7)
}
 0x4ea   :  { %1039 = dma.vmem_to_hbm [thread:$0]  %s1037_s3, 32, %s1720_s4, [#allocation3]  }
 0x4eb   :  { %1387 = dma.done.wait [#allocation3], 32  }
 0x4ec   :  { %1388 = vsyncadd [#allocation3], 4294967264 }
 0x4ed   :  { %1043 = vsyncpa [#allocation3], 1 }

</bundles_post_ra>
